<compile_context>
chip_gen: v7x
topology: tpu7x:2x2x1
jax: 0.10.0
libtpu: 0.0.40
codegen_flags: <defaults>
</compile_context>

<pallas_src>
import functools
import inspect

import jax
import jax.numpy as jnp
from jax.experimental import pallas as pl
from jax.experimental.pallas import tpu as pltpu


def _round_up(x, m):
    return ((x + m - 1) // m) * m


# ---------------------------------------------------------------------------
# Capability / hardware probes (explicit checks; never wrap the real kernel).
# ---------------------------------------------------------------------------
@functools.lru_cache(maxsize=None)
def _pipeline_mode_supported():
    """Probe pl.BlockSpec(pipeline_mode=pl.Buffered(1)) on a tiny copy kernel.

    This replaces the previous broad try/except around the real kernel call:
    a failure here only disables single-buffering, it can never mask an error
    in the real kernel.
    """
    if not hasattr(pl, "Buffered"):
        return False
    try:
        params = inspect.signature(pl.BlockSpec).parameters
        if "pipeline_mode" not in params:
            return False
    except (TypeError, ValueError):
        return False

    def _probe_kernel(x_ref, o_ref):
        o_ref[...] = x_ref[...]

    try:
        fn = pl.pallas_call(
            _probe_kernel,
            out_shape=jax.ShapeDtypeStruct((16, 128), jnp.float32),
            grid=(2,),
            in_specs=[pl.BlockSpec((8, 128), lambda i: (0, 0),
                                   pipeline_mode=pl.Buffered(1))],
            out_specs=pl.BlockSpec((8, 128), lambda i: (i, 0)),
        )
        jax.jit(fn).lower(jnp.zeros((8, 128), jnp.float32)).compile()
        return True
    except Exception:  # noqa: BLE001 - isolated feature probe, not a fallback
        return False


def _default_c1_tile_target():
    """256 for the 256-wide MXUs (v6e/v7x); 128 matches v5e's 128x128 MXU."""
    try:
        kind = jax.devices()[0].device_kind.lower()
    except Exception:  # noqa: BLE001 - best-effort hardware query
        return 256
    if "v5 lite" in kind or "v5lite" in kind or "v5e" in kind:
        return 128
    return 256


def _vmem_capacity_bytes():
    try:
        cap = getattr(pltpu.get_tpu_info(), "vmem_capacity_bytes", None)
        if cap:
            return int(cap)
    except Exception:  # noqa: BLE001 - best-effort hardware query
        pass
    return 64 * 1024 * 1024  # conservative default (v7x per-core VMEM)


# ---------------------------------------------------------------------------
# Tile selection: lane-dense l_tile, C1 resident when it fits the VMEM budget.
# ---------------------------------------------------------------------------
def _choose_tiles(*, L_out, C1, C_in, C2, k1, halo, out_itemsize,
                  l_tile_target, c1_tile_target, vmem_budget, has_buffered):
    l_cap = min(_round_up(max(l_tile_target, 128), 128), _round_up(L_out, 128))

    def plan(c1_tile, n_c1):
        def est(lt):
            n_l = pl.cdiv(L_out, lt)
            L_in = n_l * lt + halo
            x_bufs = 1 if has_buffered else 2
            w_bufs = 1 if (has_buffered and n_c1 == 1) else 2
            b = x_bufs * C_in * L_in * 2                    # x block (bf16)
            b += w_bufs * c1_tile * k1 * C_in * 2           # stacked w1 (bf16)
            b += w_bufs * C2 * c1_tile * 2                  # w2 (bf16)
            b += w_bufs * (c1_tile + C2) * 4                # BN shifts (f32)
            b += 2 * C2 * lt * out_itemsize                 # output block
            b += k1 * C_in * lt * 2                         # tap scratch (bf16)
            if n_c1 > 1:
                b += C2 * lt * 4                            # conv2 accumulator
            return b

        lt = l_cap
        while lt > 128 and est(lt) > vmem_budget:
            lt -= 128
        return lt, pl.cdiv(L_out, lt), est(lt)

    # Prefer holding all conv weights resident (drops the C1 reduction axis and
    # its accumulator / re-streaming traffic) whenever it fits the budget.
    c1_full = _round_up(C1, 8)
    lt, n_l, est_b = plan(c1_full, 1)
    if C1 <= c1_tile_target or est_b <= vmem_budget:
        return lt, n_l, c1_full, 1, c1_full, est_b
    c1_tile = c1_tile_target
    n_c1 = pl.cdiv(C1, c1_tile)
    lt, n_l, est_b = plan(c1_tile, n_c1)
    return lt, n_l, c1_tile, n_c1, n_c1 * c1_tile, est_b


# ---------------------------------------------------------------------------
# Fused Pallas kernel:
#   conv1 (dilated, stride 1) + folded-BN1 + ReLU  ->  conv2 (1x1) + BN2 + ReLU
# One grid step = one (batch, L-tile, C1-tile).  conv1 is a single stacked
# matmul over the (k1*C_in)-deep contraction; conv2 accumulates over C1 tiles
# (innermost grid axis) only when C1 is tiled.
# ---------------------------------------------------------------------------
def _fused_final_block_kernel(x_len_ref, x_ref, w1_ref, sh1_ref, w2_ref,
                              sh2_ref, o_ref, xtap_ref, *opt_acc,
                              k1, dil1, c_in, l_tile, len1_off,
                              single_l_tile, single_c1_tile):
    b = pl.program_id(0)
    ci = pl.program_id(2)

    # Start of this output tile in padded-input coordinates (static when a
    # single L tile covers the sequence, so all tap slices have static offsets).
    if single_l_tile:
        t0 = 0
    else:
        t0 = pl.multiple_of(pl.program_id(1) * l_tile, l_tile)

    # ---- gather the k1 dilated taps ONCE per (b, l) tile ---------------------
    # All the unaligned lane slicing of the wide x operand happens here exactly
    # once, instead of once per tap per C1 tile.
    @pl.when(ci == 0)
    def _():
        for k in range(k1):
            xtap_ref[pl.ds(k * c_in, c_in), :] = (
                x_ref[0, :, pl.ds(t0 + k * dil1, l_tile)])

    # ---- conv1 as a single stacked matmul (contraction = k1*C_in) ------------
    # BN1 scale pre-folded into the weights; shift + ReLU epilogue feeds conv2.
    y1 = jnp.dot(w1_ref[...], xtap_ref[...], preferred_element_type=jnp.float32)
    y1 = jnp.maximum(y1 + sh1_ref[...], 0.0).astype(w2_ref.dtype)

    def _finalize(acc):
        # conv2 is k=1: masking its input past x_len1 equals zeroing the
        # pre-shift accumulator there.  (1, l_tile) iota, broadcast over C2.
        x_len1 = x_len_ref[b] + len1_off
        col = jax.lax.broadcasted_iota(jnp.int32, (1, l_tile), 1) + t0
        acc = jnp.where(col < x_len1, acc, 0.0)
        o_ref[0] = jnp.maximum(acc + sh2_ref[...], 0.0).astype(o_ref.dtype)

    if single_c1_tile:
        # No C1 reduction axis: compute, mask, shift, ReLU, store in one pass.
        _finalize(jnp.dot(w2_ref[...], y1, preferred_element_type=jnp.float32))
    else:
        o_acc = opt_acc[0]

        @pl.when(ci == 0)
        def _():
            o_acc[...] = jnp.zeros_like(o_acc)

        o_acc[...] += jnp.dot(w2_ref[...], y1,
                              preferred_element_type=jnp.float32)

        @pl.when(ci == pl.num_programs(2) - 1)
        def _():
            _finalize(o_acc[...])


# ---------------------------------------------------------------------------
# Wrapper: host-side prep (mask + bf16 cast + pad, BN folding, weight stacking)
# + pallas_call.
# ---------------------------------------------------------------------------
def jasper_final_block_fused(x, x_len, w1, scale1, shift1, w2, scale2, shift2,
                             *, k1, pad1, dil1, k2,
                             l_tile_target=1024, c1_tile_target=None,
                             out_dtype=jnp.float32, vmem_budget_bytes=None):
    """x: (B, C_in, L) f32; x_len: (B,) i32; w1: (C1, C_in, k1); w2: (C2, C1, 1)."""
    assert k2 == 1, "fused path requires a pointwise second conv"
    B, C_in, L = x.shape
    C1 = w1.shape[0]
    C2 = w2.shape[0]
    halo = dil1 * (k1 - 1)
    L_out = L + 2 * pad1 - halo                    # stride 1
    len1_off = 2 * pad1 - halo                     # x_len -> x_len after conv1

    if c1_tile_target is None:
        c1_tile_target = _default_c1_tile_target()
    has_buffered = _pipeline_mode_supported()
    if vmem_budget_bytes is None:
        vmem_budget_bytes = int(0.75 * _vmem_capacity_bytes())

    out_itemsize = jnp.dtype(out_dtype).itemsize
    (l_tile, n_l, c1_tile, n_c1, C1p, est_bytes) = _choose_tiles(
        L_out=L_out, C1=C1, C_in=C_in, C2=C2, k1=k1, halo=halo,
        out_itemsize=out_itemsize, l_tile_target=l_tile_target,
        c1_tile_target=c1_tile_target, vmem_budget=vmem_budget_bytes,
        has_buffered=has_buffered)
    L_out_p = n_l * l_tile
    L_in = L_out_p + halo

    # ---- host-side prep: mask + bf16 cast + pad in one pass; fold BN1/BN2
    #      scales into the conv weights; stack conv1 taps along the contraction.
    t_idx = jnp.arange(L, dtype=jnp.int32)
    valid = t_idx[None, :] < x_len[:, None]
    xm = jnp.where(valid[:, None, :], x, 0.0).astype(jnp.bfloat16)
    xp = jnp.pad(xm, ((0, 0), (0, 0), (pad1, pad1 + (L_out_p - L_out))))

    # (C1, C_in, k1) * scale1 -> (C1, k1, C_in) -> (C1, k1*C_in) bf16
    w1s = jnp.transpose(w1 * scale1[:, None, None], (0, 2, 1))
    w1s = w1s.reshape(C1, k1 * C_in).astype(jnp.bfloat16)
    w2f = (w2[:, :, 0] * scale2[:, None]).astype(jnp.bfloat16)   # (C2, C1)
    sh1 = shift1.astype(jnp.float32)
    if C1p != C1:                                  # zero-pad C1 for tiling
        w1s = jnp.pad(w1s, ((0, C1p - C1), (0, 0)))
        w2f = jnp.pad(w2f, ((0, 0), (0, C1p - C1)))
        sh1 = jnp.pad(sh1, (0, C1p - C1))
    sh1 = sh1.reshape(C1p, 1)
    sh2 = shift2.astype(jnp.float32).reshape(C2, 1)

    kern = functools.partial(
        _fused_final_block_kernel, k1=k1, dil1=dil1, c_in=C_in, l_tile=l_tile,
        len1_off=len1_off, single_l_tile=(n_l == 1),
        single_c1_tile=(n_c1 == 1))

    scratch = [pltpu.VMEM((k1 * C_in, l_tile), jnp.bfloat16)]   # stacked taps
    if n_c1 > 1:
        scratch.append(pltpu.VMEM((C2, l_tile), jnp.float32))   # conv2 accum

    buf1 = {"pipeline_mode": pl.Buffered(1)} if has_buffered else {}
    w_mode = buf1 if n_c1 == 1 else {}   # weights grid-invariant only if 1 tile
    x_mode = buf1                        # x block only changes with the batch

    cost = pl.CostEstimate(
        flops=int(2 * B * L_out * (k1 * C1 * C_in + C1 * C2)),
        transcendentals=0,
        bytes_accessed=int(2 * (xp.size + w1s.size + w2f.size)
                           + 4 * (sh1.size + sh2.size)
                           + out_itemsize * B * C2 * L_out_p))

    grid_spec = pltpu.PrefetchScalarGridSpec(
        num_scalar_prefetch=1,
        grid=(B, n_l, n_c1),
        in_specs=[
            pl.BlockSpec((1, C_in, L_in), lambda b, l, c, xl: (b, 0, 0),
                         **x_mode),
            pl.BlockSpec((c1_tile, k1 * C_in), lambda b, l, c, xl: (c, 0),
                         **w_mode),
            pl.BlockSpec((c1_tile, 1), lambda b, l, c, xl: (c, 0), **w_mode),
            pl.BlockSpec((C2, c1_tile), lambda b, l, c, xl: (0, c), **w_mode),
            pl.BlockSpec((C2, 1), lambda b, l, c, xl: (0, 0), **buf1),
        ],
        out_specs=pl.BlockSpec((1, C2, l_tile), lambda b, l, c, xl: (b, 0, l)),
        scratch_shapes=scratch)

    vmem_limit = int(min(int(0.9 * _vmem_capacity_bytes()),
                         max(2 * est_bytes, 32 * 1024 * 1024)))

    out = pl.pallas_call(
        kern,
        out_shape=jax.ShapeDtypeStruct((B, C2, L_out_p), out_dtype),
        grid_spec=grid_spec,
        compiler_params=pltpu.CompilerParams(
            dimension_semantics=("parallel", "parallel", "arbitrary"),
            vmem_limit_bytes=vmem_limit),
        cost_estimate=cost,
    )(x_len, xp, w1s, sh1, w2f, sh2)

    if L_out_p != L_out:
        out = out[:, :, :L_out]
    new_len = x_len + len1_off                      # conv2 is k=1 / pad=0
    return out, new_len


# ---------------------------------------------------------------------------
# JasperFinalBlock (use_dw=False, use_dr configurable) built on the kernel.
# ---------------------------------------------------------------------------
def make_jasper_final_block_params(key, in_channels, channels, kernel_sizes,
                                   bn_eps):
    def bn_fold(k, c):
        ka, kb, kc, kd = jax.random.split(k, 4)
        gamma = 1.0 + 0.1 * jax.random.normal(ka, (c,), jnp.float32)
        beta = 0.1 * jax.random.normal(kb, (c,), jnp.float32)
        mean = 0.1 * jax.random.normal(kc, (c,), jnp.float32)
        var = 0.5 + 0.1 * jnp.abs(jax.random.normal(kd, (c,), jnp.float32))
        scale = gamma / jnp.sqrt(var + bn_eps)
        shift = beta - mean * scale
        return scale, shift

    kw1, kb1, kw2, kb2 = jax.random.split(key, 4)
    c1, c2 = channels[-2], channels[-1]
    k1, k2 = kernel_sizes[-2], kernel_sizes[-1]
    w1 = 0.1 * jax.random.normal(kw1, (c1, in_channels, k1), jnp.float32)
    s1, sh1 = bn_fold(kb1, c1)
    w2 = 0.1 * jax.random.normal(kw2, (c2, c1, k2), jnp.float32)
    s2, sh2 = bn_fold(kb2, c2)
    return dict(w1=w1, s1=s1, sh1=sh1, w2=w2, s2=s2, sh2=sh2,
                k1=k1, k2=k2,
                pad1=2 * k1 // 2 - 1, dil1=2,
                pad2=k2 // 2, dil2=1)


def jasper_final_block(params, x, x_len, use_dr=False):
    if use_dr:
        x_len = x_len[0]
    if params["k2"] != 1:
        # TODO(synk): non-pointwise conv2 (kernel_sizes[-1] != 1) is not fused;
        # Jasper configs always use kernel_sizes[-1] == 1.
        raise NotImplementedError("fused JasperFinalBlock kernel assumes k2 == 1")
    return jasper_final_block_fused(
        x, x_len, params["w1"], params["s1"], params["sh1"],
        params["w2"], params["s2"], params["sh2"],
        k1=params["k1"], pad1=params["pad1"], dil1=params["dil1"],
        k2=params["k2"])


# ---------------------------------------------------------------------------
# Pure-JAX f32 (HIGHEST) reference for correctness checking.
# ---------------------------------------------------------------------------
def _ref_mask_conv_bn_relu(x, x_len, weight, scale, shift, *, kernel_size,
                           padding, dilation):
    idx = jnp.arange(x.shape[2])
    mask = (idx[None, :] < x_len[:, None]).astype(x.dtype)
    x = x * mask[:, None, :]
    y = jax.lax.conv_general_dilated(
        x, weight, window_strides=(1,), padding=[(padding, padding)],
        rhs_dilation=(dilation,), dimension_numbers=("NCH", "OIH", "NCH"),
        precision=jax.lax.Precision.HIGHEST)
    y = y * scale[None, :, None] + shift[None, :, None]
    y = jnp.maximum(y, 0.0)
    new_len = (x_len + 2 * padding - dilation * (kernel_size - 1) - 1) // 1 + 1
    return y, new_len


def jasper_final_block_ref(params, x, x_len, use_dr=False):
    if use_dr:
        x_len = x_len[0]
    x, x_len = _ref_mask_conv_bn_relu(x, x_len, params["w1"], params["s1"],
                                      params["sh1"], kernel_size=params["k1"],
                                      padding=params["pad1"],
                                      dilation=params["dil1"])
    x, x_len = _ref_mask_conv_bn_relu(x, x_len, params["w2"], params["s2"],
                                      params["sh2"], kernel_size=params["k2"],
                                      padding=params["pad2"],
                                      dilation=params["dil2"])
    return x, x_len


if __name__ == "__main__":
    key = jax.random.PRNGKey(0)
    k_param, k_x = jax.random.split(key)

    # Small, Jasper-shaped config.
    B, in_channels, L = 2, 32, 16
    channels = [48, 64]          # channels[-2], channels[-1]
    kernel_sizes = [5, 1]        # kernel_sizes[-2], kernel_sizes[-1]
    bn_eps = 1e-3

    params = make_jasper_final_block_params(k_param, in_channels, channels,
                                            kernel_sizes, bn_eps)

    x = jax.random.normal(k_x, (B, in_channels, L), jnp.float32)
    x_len = jnp.array([16, 11], dtype=jnp.int32)

    out, out_len = jasper_final_block(params, x, x_len, use_dr=False)
    out = jax.block_until_ready(out)
    out_len = jax.block_until_ready(out_len)

    ref_out, ref_len = jasper_final_block_ref(params, x, x_len, use_dr=False)
    assert out.shape == (B, channels[-1], L), out.shape
    assert jnp.array_equal(out_len, ref_len)
    # Kernel uses bf16 matmul operands with f32 accumulation; reference is
    # full-f32 HIGHEST, so the tolerance is set accordingly (errors here are
    # ~1e-2, genuine kernel bugs would be O(1)).
    assert jnp.allclose(out, ref_out, rtol=5e-2, atol=5e-2), (
        float(jnp.max(jnp.abs(out - ref_out))))

    print("KERNEL_OK")
</pallas_src>

<mosaic_0001>
module attributes {stable_mosaic.version = 11 : i64} {
  func.func @_fused_final_block_kernel(%arg0: i32, %arg1: i32, %arg2: i32, %arg3: memref<2xi32, #tpu.memory_space<smem>>, %arg4: memref<1x32x136xbf16, #tpu.memory_space<vmem>>, %arg5: memref<48x160xbf16, #tpu.memory_space<vmem>>, %arg6: memref<48x1xf32, #tpu.memory_space<vmem>>, %arg7: memref<64x48xbf16, #tpu.memory_space<vmem>>, %arg8: memref<64x1xf32, #tpu.memory_space<vmem>>, %arg9: memref<1x64x128xf32, #tpu.memory_space<vmem>>, %arg10: memref<160x128xbf16, #tpu.memory_space<vmem>>) attributes {dimension_semantics = [#tpu.dimension_semantics<parallel>, #tpu.dimension_semantics<parallel>, #tpu.dimension_semantics<arbitrary>], iteration_bounds = array<i64: 2, 1, 1>, scalar_prefetch = 1 : i64, scratch_operands = 1 : i64, tpu.core_type = #tpu.core_type<tc>, window_params = [{transform_indices = @transform_0, window_bounds = array<i64: 1, 32, 136>}, {transform_indices = @transform_1, window_bounds = array<i64: 48, 160>}, {transform_indices = @transform_2, window_bounds = array<i64: 48, 1>}, {transform_indices = @transform_3, window_bounds = array<i64: 64, 48>}, {pipeline_mode = #tpu.pipeline_mode<synchronous>, transform_indices = @transform_4, window_bounds = array<i64: 64, 1>}, {transform_indices = @transform_5, window_bounds = array<i64: 1, 64, 128>}]} {
    %c0_i32 = arith.constant 0 : i32
    %0 = arith.cmpi eq, %arg2, %c0_i32 : i32
    %1 = arith.extui %0 : i1 to i32
    %c0_i32_0 = arith.constant 0 : i32
    %2 = arith.cmpi ne, %1, %c0_i32_0 : i32
    scf.if %2 {
      %c0_19 = arith.constant 0 : index
      %c0_20 = arith.constant 0 : index
      %c0_21 = arith.constant 0 : index
      %34 = vector.load %arg4[%c0_19, %c0_20, %c0_21] : memref<1x32x136xbf16, #tpu.memory_space<vmem>>, vector<1x32x128xbf16>
      %35 = vector.shape_cast %34 : vector<1x32x128xbf16> to vector<32x128xbf16>
      %c0_22 = arith.constant 0 : index
      %c0_23 = arith.constant 0 : index
      %36 = vector.load %arg10[%c0_22, %c0_23] : memref<160x128xbf16, #tpu.memory_space<vmem>>, vector<32x128xbf16>
      tpu.vector_store %arg10[%c0_22, %c0_23], %35 {strides = array<i32>} : memref<160x128xbf16, #tpu.memory_space<vmem>>, vector<32x128xbf16>,
      %c0_24 = arith.constant 0 : index
      %c0_25 = arith.constant 0 : index
      %c2 = arith.constant 2 : index
      %37 = vector.load %arg4[%c0_24, %c0_25, %c2] : memref<1x32x136xbf16, #tpu.memory_space<vmem>>, vector<1x32x128xbf16>
      %38 = vector.shape_cast %37 : vector<1x32x128xbf16> to vector<32x128xbf16>
      %c32 = arith.constant 32 : index
      %c0_26 = arith.constant 0 : index
      %39 = vector.load %arg10[%c32, %c0_26] : memref<160x128xbf16, #tpu.memory_space<vmem>>, vector<32x128xbf16>
      tpu.vector_store %arg10[%c32, %c0_26], %38 {strides = array<i32>} : memref<160x128xbf16, #tpu.memory_space<vmem>>, vector<32x128xbf16>,
      %c0_27 = arith.constant 0 : index
      %c0_28 = arith.constant 0 : index
      %c4 = arith.constant 4 : index
      %40 = vector.load %arg4[%c0_27, %c0_28, %c4] : memref<1x32x136xbf16, #tpu.memory_space<vmem>>, vector<1x32x128xbf16>
      %41 = vector.shape_cast %40 : vector<1x32x128xbf16> to vector<32x128xbf16>
      %c64 = arith.constant 64 : index
      %c0_29 = arith.constant 0 : index
      %42 = vector.load %arg10[%c64, %c0_29] : memref<160x128xbf16, #tpu.memory_space<vmem>>, vector<32x128xbf16>
      tpu.vector_store %arg10[%c64, %c0_29], %41 {strides = array<i32>} : memref<160x128xbf16, #tpu.memory_space<vmem>>, vector<32x128xbf16>,
      %c0_30 = arith.constant 0 : index
      %c0_31 = arith.constant 0 : index
      %c6 = arith.constant 6 : index
      %43 = vector.load %arg4[%c0_30, %c0_31, %c6] : memref<1x32x136xbf16, #tpu.memory_space<vmem>>, vector<1x32x128xbf16>
      %44 = vector.shape_cast %43 : vector<1x32x128xbf16> to vector<32x128xbf16>
      %c96 = arith.constant 96 : index
      %c0_32 = arith.constant 0 : index
      %45 = vector.load %arg10[%c96, %c0_32] : memref<160x128xbf16, #tpu.memory_space<vmem>>, vector<32x128xbf16>
      tpu.vector_store %arg10[%c96, %c0_32], %44 {strides = array<i32>} : memref<160x128xbf16, #tpu.memory_space<vmem>>, vector<32x128xbf16>,
      %c0_33 = arith.constant 0 : index
      %c0_34 = arith.constant 0 : index
      %c8 = arith.constant 8 : index
      %46 = vector.load %arg4[%c0_33, %c0_34, %c8] : memref<1x32x136xbf16, #tpu.memory_space<vmem>>, vector<1x32x128xbf16>
      %47 = vector.shape_cast %46 : vector<1x32x128xbf16> to vector<32x128xbf16>
      %c128 = arith.constant 128 : index
      %c0_35 = arith.constant 0 : index
      %48 = vector.load %arg10[%c128, %c0_35] : memref<160x128xbf16, #tpu.memory_space<vmem>>, vector<32x128xbf16>
      tpu.vector_store %arg10[%c128, %c0_35], %47 {strides = array<i32>} : memref<160x128xbf16, #tpu.memory_space<vmem>>, vector<32x128xbf16>,
    } else {
    }
    %c0 = arith.constant 0 : index
    %c0_1 = arith.constant 0 : index
    %3 = vector.load %arg5[%c0, %c0_1] : memref<48x160xbf16, #tpu.memory_space<vmem>>, vector<48x160xbf16>
    %c0_2 = arith.constant 0 : index
    %c0_3 = arith.constant 0 : index
    %4 = vector.load %arg10[%c0_2, %c0_3] : memref<160x128xbf16, #tpu.memory_space<vmem>>, vector<160x128xbf16>
    %cst = arith.constant dense<0.000000e+00> : vector<48x128xf32>
    %5 = tpu.matmul %3, %4, %cst {dimension_numbers = #tpu.dot_dimension_numbers<[1], [0], [0], [1], [0, 0, 1, 1], [], []>} : vector<48x160xbf16>, vector<160x128xbf16>, vector<48x128xf32> -> vector<48x128xf32>
    %c0_4 = arith.constant 0 : index
    %c0_5 = arith.constant 0 : index
    %6 = vector.load %arg6[%c0_4, %c0_5] : memref<48x1xf32, #tpu.memory_space<vmem>>, vector<48x1xf32>
    %7 = vector.broadcast %6 : vector<48x1xf32> to vector<48x128xf32>
    %8 = arith.addf %5, %7 : vector<48x128xf32>
    %cst_6 = arith.constant 0.000000e+00 : f32
    %9 = vector.broadcast %cst_6 : f32 to vector<48x128xf32>
    %10 = arith.maximumf %8, %9 : vector<48x128xf32>
    %11 = arith.truncf %10 : vector<48x128xf32> to vector<48x128xbf16>
    %c0_7 = arith.constant 0 : index
    %c0_8 = arith.constant 0 : index
    %12 = vector.load %arg7[%c0_7, %c0_8] : memref<64x48xbf16, #tpu.memory_space<vmem>>, vector<64x48xbf16>
    %cst_9 = arith.constant dense<0.000000e+00> : vector<64x128xf32>
    %13 = tpu.matmul %12, %11, %cst_9 {dimension_numbers = #tpu.dot_dimension_numbers<[1], [0], [0], [1], [0, 0, 1, 1], [], []>} : vector<64x48xbf16>, vector<48x128xbf16>, vector<64x128xf32> -> vector<64x128xf32>
    %14 = arith.index_cast %arg0 : i32 to index
    %15 = memref.load %arg3[%14] : memref<2xi32, #tpu.memory_space<smem>>
    %c0_i32_10 = arith.constant 0 : i32
    %16 = arith.addi %15, %c0_i32_10 : i32
    %17 = tpu.iota {dimensions = array<i32: 1>} : vector<1x128xi32>
    %c0_i32_11 = arith.constant 0 : i32
    %18 = vector.broadcast %c0_i32_11 : i32 to vector<1x128xi32>
    %19 = arith.addi %17, %18 : vector<1x128xi32>
    %20 = vector.broadcast %16 : i32 to vector<1x128xi32>
    %21 = arith.cmpi slt, %19, %20 : vector<1x128xi32>
    %cst_12 = arith.constant 0.000000e+00 : f32
    %22 = vector.shape_cast %21 : vector<1x128xi1> to vector<1x128xi1>
    %23 = vector.broadcast %22 : vector<1x128xi1> to vector<64x128xi1>
    %24 = vector.broadcast %cst_12 : f32 to vector<64x128xf32>
    %25 = arith.select %23, %13, %24 : vector<64x128xi1>, vector<64x128xf32>
    %c0_13 = arith.constant 0 : index
    %c0_14 = arith.constant 0 : index
    %26 = vector.load %arg8[%c0_13, %c0_14] : memref<64x1xf32, #tpu.memory_space<vmem>>, vector<64x1xf32>
    %27 = vector.broadcast %26 : vector<64x1xf32> to vector<64x128xf32>
    %28 = arith.addf %25, %27 : vector<64x128xf32>
    %cst_15 = arith.constant 0.000000e+00 : f32
    %29 = vector.broadcast %cst_15 : f32 to vector<64x128xf32>
    %30 = arith.maximumf %28, %29 : vector<64x128xf32>
    %c0_16 = arith.constant 0 : index
    %c0_17 = arith.constant 0 : index
    %c0_18 = arith.constant 0 : index
    %31 = vector.load %arg9[%c0_16, %c0_17, %c0_18] : memref<1x64x128xf32, #tpu.memory_space<vmem>>, vector<1x64x128xf32>
    %32 = vector.shape_cast %31 : vector<1x64x128xf32> to vector<64x128xf32>
    %33 = vector.shape_cast %30 : vector<64x128xf32> to vector<1x64x128xf32>
    tpu.vector_store %arg9[%c0_16, %c0_17, %c0_18], %33 {strides = array<i32>} : memref<1x64x128xf32, #tpu.memory_space<vmem>>, vector<1x64x128xf32>,
    return
  }
  func.func @transform_0(%arg0: i32, %arg1: i32, %arg2: i32, %arg3: memref<2xi32, #tpu.memory_space<smem>>) -> (i32, i32, i32) {
    %c0_i32 = arith.constant 0 : i32
    %c0_i32_0 = arith.constant 0 : i32
    %c0_i32_1 = arith.constant 0 : i32
    return %arg0, %c0_i32, %c0_i32_0 : i32, i32, i32
  }
  func.func @transform_1(%arg0: i32, %arg1: i32, %arg2: i32, %arg3: memref<2xi32, #tpu.memory_space<smem>>) -> (i32, i32) {
    %c0_i32 = arith.constant 0 : i32
    %c0_i32_0 = arith.constant 0 : i32
    return %arg2, %c0_i32 : i32, i32
  }
  func.func @transform_2(%arg0: i32, %arg1: i32, %arg2: i32, %arg3: memref<2xi32, #tpu.memory_space<smem>>) -> (i32, i32) {
    %c0_i32 = arith.constant 0 : i32
    %c0_i32_0 = arith.constant 0 : i32
    return %arg2, %c0_i32 : i32, i32
  }
  func.func @transform_3(%arg0: i32, %arg1: i32, %arg2: i32, %arg3: memref<2xi32, #tpu.memory_space<smem>>) -> (i32, i32) {
    %c0_i32 = arith.constant 0 : i32
    %c0_i32_0 = arith.constant 0 : i32
    return %c0_i32, %arg2 : i32, i32
  }
  func.func @transform_4(%arg0: i32, %arg1: i32, %arg2: i32, %arg3: memref<2xi32, #tpu.memory_space<smem>>) -> (i32, i32) {
    %c0_i32 = arith.constant 0 : i32
    %c0_i32_0 = arith.constant 0 : i32
    %c0_i32_1 = arith.constant 0 : i32
    return %c0_i32, %c0_i32_0 : i32, i32
  }
  func.func @transform_5(%arg0: i32, %arg1: i32, %arg2: i32, %arg3: memref<2xi32, #tpu.memory_space<smem>>) -> (i32, i32, i32) {
    %c0_i32 = arith.constant 0 : i32
    %c0_i32_0 = arith.constant 0 : i32
    return %arg0, %c0_i32, %arg1 : i32, i32, i32
  }
}

</mosaic_0001>

<bundles_post_ra>
// kernel: tpu_custom_call.1
= control target key start
LH: loop header
LB: loop body
LE: loop exit
PB: predicated region body
PF: predicated region fallthrough
CT: control target
= control target key end

     0   :  { %s1504_s0 = inlined_call_operand.vmem [shape: s32[2], index: 0, kind: input, shape index: {}]   ;;  %s1505_s1 = inlined_call_operand.vmem [shape: bf16[2,32,136], index: 1, kind: input, shape index: {}]   ;;  %s1506_s2 = inlined_call_operand.vmem [shape: bf16[48,160], index: 2, kind: input, shape index: {}]   ;;  %s1507_s3 = inlined_call_operand.vmem [shape: f32[48,1], index: 3, kind: input, shape index: {}]   ;;  %s1508_s4 = inlined_call_operand.vmem [shape: bf16[64,48], index: 4, kind: input, shape index: {}]   ;;  %s1509_s5 = inlined_call_operand.vmem [shape: f32[64,1], index: 5, kind: input, shape index: {}]   ;;  %s1510_s6 = inlined_call_operand.hbm [shape: f32[2,64,128], index: 6, kind: output, shape index: {}]  }
   0x1   :  { %s11_s23 = sshll.u32 %s1504_s0, 4  ;;  %s12_s23 = int_to_ptr.vmem [resolvable:$true] %s11_s23 }
   0x2   :  { %s1121_s24 = scalar_lea.vmem %s12_s23, 16  ;;  %p1126_p1 = scmp.lt.s32.totalorder %s12_s23, %s12_s23 }
   0x3   :  { %p1122_p0 = scmp.ne.s32.totalorder %s12_s23, %s1121_s24  ;;  %p1127_p2 = scmp.lt.s32.totalorder %s1121_s24, %s1121_s24 }
   0x5   :  { %p1128_p3 = por %p1127_p2, %p1126_p1 }
   0x7   :  { %p1129_p4 = pnand %p1128_p3, %p1122_p0 }
   0x9   :  { %1132 = shalt.err (!%p1129_p4)  }
   0xa   :  { %s1215_s25 = smov [#allocation4]  }
   0xb   :  { %14 = dma.vmem_to_smem %s12_s23, 16, %s1215_s25, [#allocation3] }
   0xc   :  { %1185 = dma.done.wait [#allocation3], 16 }
   0xd   :  { %1186 = vsyncadd [#allocation3], 4294967280 }
   0xe   :  { %16 = sfence }
   0xf   :  { %17 = vsyncpa [#allocation6], 0 }
  0x10   :  { %19 = vsyncpa [#allocation6 + $0x1], 0  ;;  %s1262_s26 = smov 0   ;;  %s1264_s27 = smov 0  }
  0x11   :  { %s1266_s0 = smov 0   ;;  %s1268_s28 = smov 0  }
  0x12   :  { %s1270_s29 = smov 0   ;;  %s1272_s30 = smov 0  }
  0x13 LB: > { %s961_s7 = sadd.s32 4294967295, %s1213_s30   ;;  %s962_s8 = sadd.s32 4294967294, %s1213_s30   ;;  %s1213_s30 = sphi %s1272_s30, %s25_s30   ;;  %s1209_s29 = sphi %s1270_s29, %s1519_s29   ;;  %s1205_s28 = sphi %s1268_s28, %s1518_s28   ;;  %s1201_s0 = sphi %s1266_s0, %s1517_s0   ;;  %s1197_s27 = sphi %s1264_s27, %s1516_s27   ;;  %s1193_s26 = sphi %s1262_s26, %s1515_s26  }
  0x14   : > { %s44_s9 = sadd.s32 1, %s1209_s29  ;;  %s178_s10 = sadd.s32 1, %s1201_s0 }
  0x15   : > { %p46_p5 = scmp.ge.s32.totalorder %s44_s9, 2  ;;  %p188_p6 = scmp.ne.s32.totalorder %s1201_s0, %s1197_s27 }
  0x16   : > { %p189_p7 = scmp.eq.s32.totalorder %s961_s7, 1  ;;  %p194_p8 = scmp.ne.s32.totalorder %s1197_s27, %s1193_s26 }
  0x17   : > { %s1521_s9 = smov (%p46_p5, %s44_s9), 0  ;;  %p195_p10 = scmp.eq.s32.totalorder %s962_s8, 1 }
  0x18   : > { %p1302_p9 = por %p189_p7, %p188_p6  ;;  %s173_s12 = ssub.s32 %s1209_s29, %s1521_s9 }
  0x19   : > { %p968_p11 = scmp.ge.s32.totalorder %s1213_s30, 1  ;;  %p176_p12 = scmp.eq.s32.totalorder %s173_s12, 0 }
  0x1a   : > { %p1309_p13 = por %p195_p10, %p194_p8  ;;  %p250_p0 = scmp.lt.s32.totalorder %s1213_s30, 3 }
  0x1b   : > { %s1315_s14 = scalar_select %p176_p12, %s1201_s0, %s178_s10  }
  0x1c   : > { %p251_p1 = pnand %p968_p11, %p250_p0 }
  0x1d   : > { %p293_p2 = scmp.lt.s32.totalorder (!%p251_p1), %s1205_s28, 1  ;;  %v1216_v0 = vmov (!%p251_p1), 0   ;;  %s1217_s20 = smov (!%p251_p1), 126   ;;  %v1110_v7 = vld [vmem:[%s1506_s2 + $0x4] ss:$8 sps:$4 sm:$0xff] (!%p251_p1)   ;;  %vm557_vm0 = vcmask (!%p251_p1), 261120  }
  0x1e   : > { %254 = sbr.rel (%p251_p1) target bundleno = 676 (0x2a4), region = 40  ;;  %567 = vmatprep.subr.bf16.mxu0 (!%p251_p1), %v1216_v0  ;;  %1099 = vset.pattern.permute.xlu1 (!%p251_p1), %v1216_v0  ;;  %s1218_s21 = smov (!%p251_p1), 124   ;;  %v495_v8 = vld [vmem:[%s1507_s3 + $0x8] sm:$0xff] (!%p251_p1)  ;;  %v494_v9 = vld [vmem:[%s1507_s3] sm:$0xff] (!%p251_p1)  ;;  %v496_v10 = vld [vmem:[%s1507_s3 + $0x10] sm:$0xff] (!%p251_p1)  ;;  %vm366_vm1 = vcmask (!%p251_p1), 1031168  }
  0x1f   : > { %1098 = vset.pattern.permute.xlu0 (!%p251_p1), %v1216_v0  ;;  %s1219_s22 = smov (!%p251_p1), 122   ;;  %s1220_s25 = smov (!%p251_p1), 120   ;;  %996 = vmatprep.mubr.msk.bf16.mxu0 (!%p251_p1), %vm557_vm0, %v1110_v7  ;;  %v497_v11 = vld [vmem:[%s1507_s3 + $0x18] sm:$0xff] (!%p251_p1)  ;;  %v498_v12 = vld [vmem:[%s1507_s3 + $0x20] sm:$0xff] (!%p251_p1)  ;;  %v499_v13 = vld [vmem:[%s1507_s3 + $0x28] sm:$0xff] (!%p251_p1)  ;;  %vm401_vm2 = vcmask (!%p251_p1), 1014784  }
  0x20   : > { %v754_v14 = vld [vmem:[%s1509_s5] sm:$0xff] (!%p251_p1)  ;;  %v755_v15 = vld [vmem:[%s1509_s5 + $0x8] sm:$0xff] (!%p251_p1)  ;;  %v756_v16 = vld [vmem:[%s1509_s5 + $0x10] sm:$0xff] (!%p251_p1)  ;;  %vm436_vm3 = vcmask (!%p251_p1), 998400   ;;  %vm471_vm4 = vcmask (!%p251_p1), 982016   ;;  %vm661_vm5 = vcmask (!%p251_p1), 392192  }
  0x21   : > { %v757_v17 = vld [vmem:[%s1509_s5 + $0x18] sm:$0xff] (!%p251_p1)  ;;  %v758_v18 = vld [vmem:[%s1509_s5 + $0x20] sm:$0xff] (!%p251_p1)  ;;  %v759_v19 = vld [vmem:[%s1509_s5 + $0x28] sm:$0xff] (!%p251_p1)  ;;  %s739_s8 = sld [smem:[#allocation4 + %s1205_s28]] (!%p251_p1)  ;;  %s290_s10 = sand.u32 (!%p251_p1), 1, %s1197_s27  }
  0x22   : > { %v760_v20 = vld [vmem:[%s1509_s5 + $0x30] sm:$0xff] (!%p251_p1)  ;;  %v761_v21 = vld [vmem:[%s1509_s5 + $0x38] sm:$0xff] (!%p251_p1)  ;;  %v1108_v46 = vld [vmem:[%s1506_s2] ss:$8 sps:$4 sm:$0xff] (!%p251_p1)   ;;  %s969_s12 = sshll.u32 (!%p251_p1), %s290_s10, 6 }
  0x23   : > { %v1111_v47 = vld [vmem:[%s1506_s2 + $0x14] ss:$8 sps:$4 sm:$0xff] (!%p251_p1)   ;;  %v1113_v48 = vld [vmem:[%s1506_s2 + $0x10] ss:$8 sps:$4 sm:$0xff] (!%p251_p1)   ;;  %v1114_v49 = vld [vmem:[%s1506_s2 + $0x24] ss:$8 sps:$4 sm:$0xff] (!%p251_p1)  }
  0x24   : > { %v1116_v50 = vld [vmem:[%s1506_s2 + $0x20] ss:$8 sps:$4 sm:$0xff] (!%p251_p1)  }
  0x25   : > { %s294_s15 = scalar_select %p293_p2, %s1205_s28, 1  ;;  %v1117_v51 = vld [vmem:[%s1508_s4] sm:$0xff]  }
  0x26   : > { %1027 = vmatprep.mubr.msk.bf16.mxu1 %vm661_vm5, %v1117_v51 }
  0x27   : > { %s1012_s16 = sshll.u32 %s294_s15, 5  ;;  %s1429_s15 = scalar_lea.vmem [#allocation5], %s969_s12 }
  0x28   : > { %s297_s19 = scalar_lea.vmem %s1505_s1, %s1012_s16  ;;  %s1013_s16 = sshll.u32 %s1205_s28, 10 }
  0x29   : > { %v1100_v1 = vld [vmem:[%s297_s19 + $0x10] ss:$8 sps:$4 sm:$0xff]   ;;  %v1102_v2 = vld [vmem:[%s297_s19 + $0x14] ss:$8 sps:$4 sm:$0xff]   ;;  %v1103_v3 = vld [vmem:[%s297_s19] ss:$8 sps:$4 sm:$0xff]  }
  0x2a   : > { %362 = vrot.lane.b32.xlu1 %v1100_v1, %s1217_s20  ;;  %v1106_v4 = vld [vmem:[%s297_s19] ss:$8 sps:$4 sm:$0xff]   ;;  %v1105_v5 = vld [vmem:[%s297_s19 + $0x4] ss:$8 sps:$4 sm:$0xff]   ;;  %358 = vrot.lane.b32.xlu0 %v1103_v3, %s1217_s20  ;;  %s841_s17 = sshll.u32 %s1429_s15, 4  ;;  %s1458_s28 = scalar_lea.sflag [#allocation6], %s290_s10  ;;  %s1451_s17 = int_to_ptr.vmem [resolvable:$true] %s841_s17 }
  0x2b   : > { %568 = vmatpush1.bf16.msra.mxu0 %v1106_v4  ;;  %v1107_v6 = vld [vmem:[%s297_s19 + $0x10] ss:$8 sps:$4 sm:$0xff]  }
  0x2c   : > { %569 = vmatprep.subr.bf16.mxu0 %v1216_v0 }
  0x2e   : > { %364 = vrot.lane.b32.xlu1 %v1102_v2, %s1217_s20  ;;  %360 = vrot.lane.b32.xlu0 %v1105_v5, %s1217_s20  ;;  %s1449_s20 = scalar_lea.hbm %s1510_s6, %s1013_s16 }
  0x2f   : > { %570 = vmatpush1.bf16.msra.mxu0 %v1107_v6 }
  0x30   : > { %571 = vmatprep.subr.bf16.mxu0 %v1216_v0 }
  0x32   : > { %395 = vrot.lane.b32.xlu1 %v1105_v5, %s1218_s21  ;;  %393 = vrot.lane.b32.xlu0 %v1103_v3, %s1218_s21 }
  0x36   : > { %399 = vrot.lane.b32.xlu1 %v1102_v2, %s1218_s21  ;;  %397 = vrot.lane.b32.xlu0 %v1100_v1, %s1218_s21  ;;  %s1133_s21 = scalar_lea.vmem %s1451_s17, 1024 }
  0x37   : > { %p1134_p3 = scmp.ne.s32.totalorder %s1451_s17, %s1133_s21 }
  0x39   : > { %p1135_p4 = pnand %p1134_p3, %p1302_p9 }
  0x3a   : > { %430 = vrot.lane.b32.xlu1 %v1105_v5, %s1219_s22  ;;  %428 = vrot.lane.b32.xlu0 %v1103_v3, %s1219_s22 }
  0x3b   : > { %p1136_p5 = pneg %p1135_p4 }
  0x3e   : > { %434 = vrot.lane.b32.xlu1 %v1102_v2, %s1219_s22  ;;  %432 = vrot.lane.b32.xlu0 %v1100_v1, %s1219_s22  ;;  %s1221_s22 = smov [#allocation5]  }
  0x3f   : > { %s1137_s23 = sshll.u32 %s1221_s22, 4  ;;  %s1138_s23 = int_to_ptr.vmem [resolvable:$false] %s1137_s23 }
  0x40   : > { %s1139_s24 = scalar_lea.vmem %s1138_s23, 2048  ;;  %p1140_p6 = scmp.lt.s32.totalorder %s1451_s17, %s1138_s23 }
  0x41   : > { %p1141_p7 = scmp.lt.s32.totalorder %s1139_s24, %s1133_s21 }
  0x42   : > { %465 = vrot.lane.b32.xlu1 %v1105_v5, %s1220_s25  ;;  %463 = vrot.lane.b32.xlu0 %v1103_v3, %s1220_s25 }
  0x43   : > { %p1142_p8 = por %p1141_p7, %p1140_p6 }
  0x45   : > { %p1143_p10 = pnand %p1142_p8, %p1136_p5 }
  0x46   : > { %469 = vrot.lane.b32.xlu1 %v1102_v2, %s1220_s25  ;;  %467 = vrot.lane.b32.xlu0 %v1100_v1, %s1220_s25 }
  0x4a   : > { %507 = vperm.xlu1 %1099, %v495_v8   ;;  %502 = vperm.xlu0 %1098, %v494_v9  }
  0x4e   : > { %512 = vperm.xlu1 %1099, %v496_v10   ;;  %517 = vperm.xlu0 %1098, %v497_v11  }
  0x52   : > { %522 = vperm.xlu1 %1099, %v498_v12   ;;  %527 = vperm.xlu0 %1098, %v499_v13  }
  0x56   : > { %764 = vperm.xlu1 %1099, %v754_v14   ;;  %769 = vperm.xlu0 %1098, %v755_v15  }
  0x5a   : > { %774 = vperm.xlu1 %1099, %v756_v16   ;;  %779 = vperm.xlu0 %1098, %v757_v17  }
  0x5e   : > { %784 = vperm.xlu1 %1099, %v758_v18   ;;  %789 = vperm.xlu0 %1098, %v759_v19  }
  0x62   : > { %794 = vperm.xlu1 %1099, %v760_v20   ;;  %799 = vperm.xlu0 %1098, %v761_v21   ;;  %v1118_v21 = vld [vmem:[%s1508_s4 + $0x8] sm:$0xff]  }
  0x9c   : > { %v363_v22 = vpop.permute.xlu1 %362  ;;  %v359_v23 = vpop.permute.xlu0 %358 }
  0xa0   : > { %v365_v24 = vpop.permute.xlu1 %364  ;;  %v361_v25 = vpop.permute.xlu0 %360 }
  0xa1   : > { %v367_v26 = vsel %vm366_vm1, %v359_v23, %v361_v25  ;;  %v368_v29 = vsel %vm366_vm1, %v363_v22, %v365_v24  ;;  %v1119_v22 = vld [vmem:[%s1508_s4 + $0x10] sm:$0xff]   ;;  %v1120_v23 = vld [vmem:[%s1508_s4 + $0x18] sm:$0xff]   ;;  %v740_v24 = vlaneseq }
  0xa2   : > { %572 = vmatpush1.bf16.msra.mxu0 %v367_v26 }
  0xa3   : > { %573 = vmatprep.subr.bf16.mxu0 %v1216_v0 }
  0xa4   : > { %v396_v27 = vpop.permute.xlu1 %395  ;;  %v394_v28 = vpop.permute.xlu0 %393 }
  0xa5   : > { %v402_v31 = vsel %vm401_vm2, %v394_v28, %v396_v27  ;;  %v741_v27 = vand.u32 127, %v740_v24  ;;  %v742_v28 = vstv %s739_s8 }
  0xa6   : > { %574 = vmatpush1.bf16.msra.mxu0 %v368_v29 }
  0xa7   : > { %575 = vmatprep.subr.bf16.mxu0 %v1216_v0  ;;  %vm1415_vm6 = vcmp.lt.s32.totalorder %v741_v27, %v742_v28 }
  0xa8   : > { %v400_v30 = vpop.permute.xlu1 %399  ;;  %v398_v32 = vpop.permute.xlu0 %397 }
  0xa9   : > { %v403_v34 = vsel %vm401_vm2, %v398_v32, %v400_v30 }
  0xaa   : > { %576 = vmatpush1.bf16.msra.mxu0 %v402_v31 }
  0xab   : > { %577 = vmatprep.subr.bf16.mxu0 %v1216_v0 }
  0xac   : > { %v431_v33 = vpop.permute.xlu1 %430  ;;  %v429_v35 = vpop.permute.xlu0 %428 }
  0xad   : > { %v437_v37 = vsel %vm436_vm3, %v429_v35, %v431_v33 }
  0xae   : > { %578 = vmatpush1.bf16.msra.mxu0 %v403_v34 }
  0xaf   : > { %579 = vmatprep.subr.bf16.mxu0 %v1216_v0 }
  0xb0   : > { %v435_v36 = vpop.permute.xlu1 %434  ;;  %v433_v38 = vpop.permute.xlu0 %432 }
  0xb1   : > { %v438_v40 = vsel %vm436_vm3, %v433_v38, %v435_v36 }
  0xb2   : > { %580 = vmatpush1.bf16.msra.mxu0 %v437_v37 }
  0xb3   : > { %581 = vmatprep.subr.bf16.mxu0 %v1216_v0 }
  0xb4   : > { %v466_v39 = vpop.permute.xlu1 %465  ;;  %v464_v41 = vpop.permute.xlu0 %463 }
  0xb5   : > { %v472_v42 = vsel %vm471_vm4, %v464_v41, %v466_v39 }
  0xb6   : > { %582 = vmatpush1.bf16.msra.mxu0 %v438_v40 }
  0xb7   : > { %583 = vmatprep.subr.bf16.mxu0 %v1216_v0 }
  0xb8   : > { %v470_v43 = vpop.permute.xlu1 %469  ;;  %v468_v44 = vpop.permute.xlu0 %467 }
  0xb9   : > { %v473_v45 = vsel %vm471_vm4, %v468_v44, %v470_v43 }
  0xba   : > { %584 = vmatpush1.bf16.msra.mxu0 %v472_v42 }
  0xbb   : > { %585 = vmatprep.subr.bf16.mxu0 %v1216_v0 }
  0xbe   : > { %586 = vmatpush1.bf16.msra.mxu0 %v473_v45 }
  0xc1   : > { %600 = vmatmul.mubr.bf16.vlgmr.msra.gmra.mrb[0].mxu0 %v1108_v46 }
  0xc2   : > { %997 = vmatprep.mubr.msk.bf16.mxu0 %vm557_vm0, %v1111_v47 }
  0xc9   : > { %608 = vmatmul.mubr.bf16.gmra.mrb[4].mxu0 %v1113_v48  ;;  %v503_v52 = vpop.permute.xlu0 %502  ;;  %v508_v56 = vpop.permute.xlu1 %507 }
  0xca   : > { %998 = vmatprep.mubr.msk.bf16.mxu0 %vm557_vm0, %v1114_v49 }
  0xcd   : > { %v513_v63 = vpop.permute.xlu1 %512  ;;  %v518_v3 = vpop.permute.xlu0 %517 }
  0xd1   : > { %616 = vmatmul.mubr.bf16.gmra.mrb[8].mxu0 %v1116_v50  ;;  %v523_v10 = vpop.permute.xlu1 %522  ;;  %v528_v14 = vpop.permute.xlu0 %527 }
  0xd5   : > { %v765_v25 = vpop.permute.xlu1 %764  ;;  %v770_v26 = vpop.permute.xlu0 %769 }
  0xd9   : > { %v775_v29 = vpop.permute.xlu1 %774  ;;  %v780_v31 = vpop.permute.xlu0 %779 }
  0xdd   : > { %v785_v38 = vpop.permute.xlu1 %784  ;;  %v790_v45 = vpop.permute.xlu0 %789 }
  0xe1   : > { %v795_v51 = vpop.permute.xlu1 %794 }
 0x194   : > { %v601_v53 = vpop.f32.mrb[0].mxu0 }
 0x195   : > { %v602_v54 = vadd.f32 %v601_v53, %v503_v52  ;;  %v603_v55 = vpop.f32.mrb[1].mxu0 }
 0x196   : > { %v604_v57 = vpop.f32.mrb[2].mxu0 }
 0x197   : > { %v605_v58 = vadd.f32 %v604_v57, %v508_v56  ;;  %v606_v59 = vpop.f32.mrb[3].mxu0  ;;  %v624_v60 = vmax.f32 %v602_v54, 0.0  ;;  %v800_v57 = vpop.permute.xlu0 %799 }
 0x199   : > { %v625_v61 = vmax.f32 %v605_v58, 0.0 }
 0x19b   : > { %v630_v62 = vpack.c.bf16 %v625_v61, %v624_v60 }
 0x19c   : > { %v609_v0 = vpop.f32.mrb[4].mxu0 }
 0x19d   : > { %v610_v1 = vadd.f32 %v609_v0, %v513_v63  ;;  %v611_v2 = vpop.f32.mrb[5].mxu0  ;;  %1021 = vmatprep.subr.bf16.mxu1 %v630_v62 }
 0x19e   : > { %v612_v4 = vpop.f32.mrb[6].mxu0  ;;  %1022 = vmatpush3.bf16.msra.mxu1 %v630_v62 }
 0x19f   : > { %v613_v5 = vadd.f32 %v612_v4, %v518_v3  ;;  %v614_v6 = vpop.f32.mrb[7].mxu0  ;;  %v626_v7 = vmax.f32 %v610_v1, 0.0 }
 0x1a1   : > { %v627_v8 = vmax.f32 %v613_v5, 0.0 }
 0x1a3   : > { %v631_v9 = vpack.c.bf16 %v627_v8, %v626_v7 }
 0x1a4   : > { %v617_v11 = vpop.f32.mrb[8].mxu0 }
 0x1a5   : > { %v618_v12 = vadd.f32 %v617_v11, %v523_v10  ;;  %v619_v13 = vpop.f32.mrb[9].mxu0  ;;  %1023 = vmatprep.subr.bf16.mxu1 %v631_v9 }
 0x1a6   : > { %v620_v15 = vpop.f32.mrb[10].mxu0  ;;  %1024 = vmatpush3.bf16.msra.mxu1 %v631_v9 }
 0x1a7   : > { %v621_v16 = vadd.f32 %v620_v15, %v528_v14  ;;  %v622_v17 = vpop.f32.mrb[11].mxu0  ;;  %v628_v18 = vmax.f32 %v618_v12, 0.0 }
 0x1a9   : > { %v629_v19 = vmax.f32 %v621_v16, 0.0 }
 0x1ab   : > { %v632_v20 = vpack.c.bf16 %v629_v19, %v628_v18 }
 0x1ad   : > { %1025 = vmatprep.subr.bf16.mxu1 %v632_v20 }
 0x1ae   : > { %1026 = vmatpush3.bf16.msra.mxu1 %v632_v20 }
 0x1b1   : > { %1028 = vmatmul.mubr.msk.bf16.vlgmr.msra.gmra.mrb[0].mxu1 %vm661_vm5, %v1118_v21 }
 0x1b2   : > { %1031 = vmatprep.mubr.msk.bf16.mxu1 %vm661_vm5, %v1119_v22 }
 0x1b9   : > { %1032 = vmatmul.mubr.msk.bf16.gmra.mrb[4].mxu1 %vm661_vm5, %v1120_v23 }
 0x284   : > { %v1029_v32 = vpop.f32.mrb[0].mxu1 }
 0x285   : > { %v748_v33 = vsel %vm1415_vm6, %v1029_v32, 0.0  ;;  %v708_v34 = vpop.f32.mrb[1].mxu1 }
 0x286   : > { %v804_v35 = vadd.f32 %v775_v29, %v748_v33  ;;  %v746_v36 = vsel %vm1415_vm6, %v708_v34, 0.0  ;;  %v1030_v37 = vpop.f32.mrb[2].mxu1 }
 0x287   : > { %v802_v39 = vadd.f32 %v765_v25, %v746_v36  ;;  %v749_v40 = vsel %vm1415_vm6, %v1030_v37, 0.0  ;;  %v711_v41 = vpop.f32.mrb[3].mxu1 }
 0x288   : > { %v812_v42 = vmax.f32 %v804_v35, 0.0  ;;  %v805_v43 = vadd.f32 %v780_v31, %v749_v40  ;;  %v747_v44 = vsel %vm1415_vm6, %v711_v41, 0.0 }
 0x289   : > { %v810_v46 = vmax.f32 %v802_v39, 0.0  ;;  %v803_v47 = vadd.f32 %v770_v26, %v747_v44 }
 0x28a   : > { %820 = vst [vmem:[%s1429_s15 + $0x10] sm:$0xff] %v812_v42  ;;  %v813_v48 = vmax.f32 %v805_v43, 0.0 }
 0x28b   : > { %818 = vst [vmem:[%s1429_s15] sm:$0xff] %v810_v46  ;;  %v811_v49 = vmax.f32 %v803_v47, 0.0 }
 0x28c   : > { %821 = vst [vmem:[%s1429_s15 + $0x18] sm:$0xff] %v813_v48  ;;  %v1033_v50 = vpop.f32.mrb[4].mxu1 }
 0x28d   : > { %819 = vst [vmem:[%s1429_s15 + $0x8] sm:$0xff] %v811_v49  ;;  %v752_v52 = vsel %vm1415_vm6, %v1033_v50, 0.0  ;;  %v724_v53 = vpop.f32.mrb[5].mxu1 }
 0x28e   : > { %v808_v54 = vadd.f32 %v795_v51, %v752_v52  ;;  %v750_v55 = vsel %vm1415_vm6, %v724_v53, 0.0  ;;  %v1034_v56 = vpop.f32.mrb[6].mxu1 }
 0x28f   : > { %v806_v58 = vadd.f32 %v785_v38, %v750_v55  ;;  %v753_v59 = vsel %vm1415_vm6, %v1034_v56, 0.0  ;;  %v727_v60 = vpop.f32.mrb[7].mxu1 }
 0x290   : > { %v816_v61 = vmax.f32 %v808_v54, 0.0  ;;  %v809_v62 = vadd.f32 %v800_v57, %v753_v59  ;;  %v751_v63 = vsel %vm1415_vm6, %v727_v60, 0.0 }
 0x291   : > { %v814_v0 = vmax.f32 %v806_v58, 0.0  ;;  %v807_v1 = vadd.f32 %v790_v45, %v751_v63 }
 0x292   : > { %824 = vst [vmem:[%s1429_s15 + $0x30] sm:$0xff] %v816_v61  ;;  %v817_v2 = vmax.f32 %v809_v62, 0.0 }
 0x293   : > { %822 = vst [vmem:[%s1429_s15 + $0x20] sm:$0xff] %v814_v0  ;;  %v815_v3 = vmax.f32 %v807_v1, 0.0 }
 0x294   : > { %825 = vst [vmem:[%s1429_s15 + $0x38] sm:$0xff] %v817_v2 }
 0x295   : > { %823 = vst [vmem:[%s1429_s15 + $0x28] sm:$0xff] %v815_v3 }
 0x296   : > { %1146 = shalt.err (!%p1143_p10)
}
 0x297   : > { %s1147_s25 = scalar_lea.hbm %s1449_s20, 1024  ;;  %s1151_s10 = scalar_lea.hbm %s1510_s6, 2048 }
 0x298   : > { %p1148_p11 = scmp.ne.s32.totalorder %s1449_s20, %s1147_s25  ;;  %p1152_p1 = scmp.lt.u32.totalorder %s1449_s20, %s1510_s6 }
 0x299   : > { %p1153_p2 = scmp.lt.u32.totalorder %s1151_s10, %s1147_s25  ;;  %p1155_p4 = scmp.lt.u32.totalorder %s1147_s25, %s1449_s20 }
 0x29a   : > { %p1149_p12 = pnand %p1148_p11, %p1302_p9 }
 0x29b   : > { %p1154_p3 = por %p1153_p2, %p1152_p1 }
 0x29c   : > { %p1150_p0 = pneg %p1149_p12 }
 0x29d   : > { %p1156_p5 = por %p1155_p4, %p1154_p3 }
 0x29f   : > { %p1157_p6 = pnand %p1156_p5, %p1150_p0 }
 0x2a1   : > { %1160 = shalt.err (!%p1157_p6)
}
 0x2a2   : > { %s1222_s16 = smov 128   ;;  %s1223_s18 = smov 8  }
 0x2a3   : > { %1035 = dma.vmem_to_hbm [thread:$0]  (%p1302_p9), %s1451_s17, 1024, %s1449_s20, %s1458_s28, %s1222_s16, %s1222_s16, %s1223_s18  }
 0x2a4 PF: > { %p1041_p7 = scmp.ge.s32.totalorder %s1213_s30, 2  ;;  %s856_s19 = sand.u32 1, %s1193_s26  }
 0x2a5   : > { %s857_s21 = scalar_lea.sflag [#allocation6], %s856_s19 }
 0x2a6   : > { %p1038_p8 = pnand %p1041_p7, %p1309_p13 }
 0x2a8   : > { %1188 = dma.done.wait (!%p1038_p8), %s857_s21, 1024  }
 0x2a9   : > { %1190 = vsyncadd (!%p1038_p8), %s857_s21, 4294966272  ;;  %s25_s30 = sadd.s32 1, %s1213_s30   ;;  %s1515_s26 = smov %s1197_s27 }
 0x2aa   : > { %p22_p10 = scmp.ge.s32.totalorder %s25_s30, 4   ;;  %s1516_s27 = smov %s1201_s0 }
 0x2ab   : > { %s1517_s0 = smov %s1315_s14  ;;  %s1518_s28 = smov %s1209_s29 }
 0x2ac   : > { %s1519_s29 = smov %s1521_s9  ;;  %24 = sbr.rel (!%p22_p10) target bundleno = 19 (0x13), region = 88 }
 0x2b3   :  { %862 = vsyncpa [#allocation6], 1 }
 0x2b4   :  { %864 = vsyncpa [#allocation6 + $0x1], 1 }

</bundles_post_ra>
